<compile_context>
chip_gen: v7x
topology: tpu7x:2x2x1
jax: 0.10.0
libtpu: 0.0.40
codegen_flags: <defaults>
</compile_context>

<pallas_src>
import jax
import jax.numpy as jnp
from jax.experimental import pallas as pl
from jax.experimental.pallas import tpu as pltpu

_LANES = 128
_SUBLANES = 8
_MAX_TILE_ROWS = 512                     # HBM roofline saturates by ~512-1024 rows
_MXU_ONES_MAX_BYTES = 8 * 1024 * 1024    # cap on the lane-padded (C,128) f32 ones RHS


def _make_row_loss_kernel(use_mxu_sums):
    """Per-row soft-label cross entropy for one (TB, C) batch tile."""

    def kernel(logits_ref, targets_ref, loss_ref):
        x = logits_ref[...].astype(jnp.float32)      # (TB, C)
        t = targets_ref[...].astype(jnp.float32)     # (TB, C)

        # Numerically-stable LSE pieces; all math is row-local.
        m = jnp.max(x, axis=1, keepdims=True)        # (TB, 1)  VPU/XLU
        p = jnp.exp(x - m)                           # (TB, C)  EUP
        tx = t * x                                   # (TB, C)  VPU

        if use_mxu_sums:
            # Lane-axis sums on the otherwise-idle MXU (vector-extended slot),
            # keeping the VALU slot free so the kernel stays HBM-bound on v7x /
            # bf16-v6e.  ones is (C, 128); column 0 of each dot is the row sum.
            ones = jnp.ones((x.shape[1], _LANES), jnp.float32)
            l = jnp.dot(p, ones, preferred_element_type=jnp.float32)[:, :1]
            t_sum = jnp.dot(t, ones, preferred_element_type=jnp.float32)[:, :1]
            tx_sum = jnp.dot(tx, ones, preferred_element_type=jnp.float32)[:, :1]
        else:
            l = jnp.sum(p, axis=1, keepdims=True)
            t_sum = jnp.sum(t, axis=1, keepdims=True)
            tx_sum = jnp.sum(tx, axis=1, keepdims=True)

        # -sum_j t_j*(x_j - m - lse) == sum(t)*(m + lse) - sum(t*x)
        loss_ref[...] = t_sum * (m + jnp.log(l)) - tx_sum   # (TB, 1)

    return kernel


def _scoped_vmem_limit_bytes():
    """Generation-aware scoped VMEM limit (conservative fallback)."""
    default = 32 * 1024 * 1024  # safe on v5e / v6e / v7x
    try:
        cap = int(pltpu.get_tpu_info().vmem_capacity_bytes)
        # Up to half of physical VMEM: v7x (64 MiB) -> 32 MiB, v5e/v6e -> 64 MiB.
        return max(default, min(cap // 2, 96 * 1024 * 1024))
    except Exception:
        return default


def _use_mxu_sums(C, in_itemsize):
    """MXU row-sum path: sub-32-bit inputs (where VALU pressure matters), a
    lane-aligned class dim (no contraction-padding concerns), and a modest
    ones-RHS footprint (lane-padded to (C,128) f32 in VMEM)."""
    return (
        in_itemsize < 4
        and C % _LANES == 0
        and C * _LANES * 4 <= _MXU_ONES_MAX_BYTES
    )


def _pick_tile_rows(B, C, in_itemsize, budget_bytes, mxu_sums):
    """Pick a sublane-aligned batch tile using the corrected footprint model."""
    # Per-row footprint:
    #   * pipelined input buffers: 2 arrays x 2 buffers x C x itemsize
    #   * in-kernel f32 intermediates (x, t, exp(x-m), t*x):   ~4 x C x 4
    per_row = C * (4 * in_itemsize + 16)
    fixed = (C * _LANES * 4) if mxu_sums else 0     # ones RHS for the MXU sums
    avail = max(budget_bytes - fixed, per_row * _SUBLANES)
    tb = max(avail // per_row, _SUBLANES)

    # Cap: bigger tiles add no HBM bandwidth, only VMEM/vreg pressure.
    tb = min(tb, _MAX_TILE_ROWS)

    # Keep >= ~4 grid steps on moderate/large batches: software pipelining of
    # the input DMA plus v7x megacore sharding of the "parallel" batch axis.
    if B >= 4 * _SUBLANES:
        tb = min(tb, max(_SUBLANES, pl.cdiv(B, 4)))

    if tb >= B:
        return int(B)                 # whole batch in one block (block == full dims)
    return int(max((tb // _SUBLANES) * _SUBLANES, _SUBLANES))


def custom_cross_entropy_pskd(output, targets, reduction="mean", *, tile_rows=None):
    """Pallas TPU implementation of Custom_CrossEntropy_PSKD.forward."""
    assert output.ndim == 2 and output.shape == targets.shape
    B, C = output.shape

    vmem_limit = _scoped_vmem_limit_bytes()
    budget = vmem_limit - 6 * 1024 * 1024           # headroom for output blocks / misc

    itemsize = max(jnp.dtype(output.dtype).itemsize, jnp.dtype(targets.dtype).itemsize)
    mxu_sums = _use_mxu_sums(C, itemsize)

    if tile_rows is None:
        tb = _pick_tile_rows(B, C, itemsize, budget, mxu_sums)
    else:
        tb = int(tile_rows)
        assert tb == B or tb % _SUBLANES == 0, "tile_rows must be a multiple of 8 or equal B"

    grid = (pl.cdiv(B, tb),)

    row_losses = pl.pallas_call(
        _make_row_loss_kernel(mxu_sums),
        out_shape=jax.ShapeDtypeStruct((B, 1), jnp.float32),
        grid_spec=pltpu.PrefetchScalarGridSpec(
            num_scalar_prefetch=0,
            grid=grid,
            in_specs=[
                pl.BlockSpec((tb, C), lambda i: (i, 0)),
                pl.BlockSpec((tb, C), lambda i: (i, 0)),
            ],
            out_specs=pl.BlockSpec((tb, 1), lambda i: (i, 0)),
        ),
        compiler_params=pltpu.CompilerParams(
            dimension_semantics=("parallel",),
            vmem_limit_bytes=vmem_limit,
        ),
    )(output, targets)

    if reduction == "mean":
        # (-t * log_probs).mean(0).sum() == sum over all rows / B
        return jnp.sum(row_losses) / jnp.float32(B)
    return row_losses[:, 0]


def _reference(output, targets, reduction="mean"):
    log_probs = jax.nn.log_softmax(output.astype(jnp.float32), axis=1)
    t = targets.astype(jnp.float32)
    if reduction == "mean":
        return jnp.sum(jnp.mean(-t * log_probs, axis=0))
    return jnp.sum(-t * log_probs, axis=1)


def _soft_targets(key, shape, dtype=jnp.float32):
    raw = jax.random.uniform(key, shape, dtype=jnp.float32)
    return (raw / jnp.sum(raw, axis=1, keepdims=True)).astype(dtype)


if __name__ == "__main__":
    key = jax.random.PRNGKey(0)
    k1, k2, k3, k4, k5, k6, k7, k8 = jax.random.split(key, 8)

    # --- small shape consistent with the module: (batch, num_classes), f32 ---
    B, C = 8, 128
    logits = jax.random.normal(k1, (B, C), dtype=jnp.float32)
    targets = _soft_targets(k2, (B, C))

    loss_mean = custom_cross_entropy_pskd(logits, targets, reduction="mean")
    loss_none = custom_cross_entropy_pskd(logits, targets, reduction="none")
    jax.block_until_ready((loss_mean, loss_none))
    assert jnp.allclose(loss_mean, _reference(logits, targets, "mean"), rtol=1e-5, atol=1e-5)
    assert jnp.allclose(loss_none, _reference(logits, targets, "none"), rtol=1e-5, atol=1e-5)

    # --- bf16 inputs, explicit small tile (edge batch block 80 % 24 != 0), MXU-sum path ---
    B2, C2 = 80, 256
    logits2 = jax.random.normal(k3, (B2, C2), dtype=jnp.float32).astype(jnp.bfloat16)
    targets2 = _soft_targets(k4, (B2, C2), jnp.bfloat16)
    lm2 = custom_cross_entropy_pskd(logits2, targets2, "mean", tile_rows=24)
    ln2 = custom_cross_entropy_pskd(logits2, targets2, "none", tile_rows=24)
    jax.block_until_ready((lm2, ln2))
    assert jnp.allclose(lm2, _reference(logits2, targets2, "mean"), rtol=2e-2, atol=2e-2)
    assert jnp.allclose(ln2, _reference(logits2, targets2, "none"), rtol=2e-2, atol=2e-2)

    # --- non-lane-aligned class dim (C=1000): exercises Mosaic lane masking on the sum path ---
    B3, C3 = 16, 1000
    logits3 = jax.random.normal(k5, (B3, C3), dtype=jnp.float32)
    targets3 = _soft_targets(k6, (B3, C3))
    lm3 = custom_cross_entropy_pskd(logits3, targets3, "mean")
    ln3 = custom_cross_entropy_pskd(logits3, targets3, "none")
    jax.block_until_ready((lm3, ln3))
    assert jnp.allclose(lm3, _reference(logits3, targets3, "mean"), rtol=1e-5, atol=1e-5)
    assert jnp.allclose(ln3, _reference(logits3, targets3, "none"), rtol=1e-5, atol=1e-5)

    # --- auto-picked multi-step grid (B=96 -> tb=24, 4 grid steps), f32 sum path ---
    B4, C4 = 96, 384
    logits4 = jax.random.normal(k7, (B4, C4), dtype=jnp.float32)
    targets4 = _soft_targets(k8, (B4, C4))
    lm4 = custom_cross_entropy_pskd(logits4, targets4, "mean")
    ln4 = custom_cross_entropy_pskd(logits4, targets4, "none")
    jax.block_until_ready((lm4, ln4))
    assert jnp.allclose(lm4, _reference(logits4, targets4, "mean"), rtol=1e-5, atol=1e-5)
    assert jnp.allclose(ln4, _reference(logits4, targets4, "none"), rtol=1e-5, atol=1e-5)

    print("KERNEL_OK")
</pallas_src>

<mosaic_0001>
module attributes {stable_mosaic.version = 11 : i64} {
  func.func @kernel(%arg0: i32, %arg1: memref<8x128xf32, #tpu.memory_space<vmem>>, %arg2: memref<8x128xf32, #tpu.memory_space<vmem>>, %arg3: memref<8x1xf32, #tpu.memory_space<vmem>>) attributes {dimension_semantics = [#tpu.dimension_semantics<parallel>], iteration_bounds = array<i64: 1>, scalar_prefetch = 0 : i64, scratch_operands = 0 : i64, tpu.core_type = #tpu.core_type<tc>, window_params = [{transform_indices = @transform_0, window_bounds = array<i64: 8, 128>}, {transform_indices = @transform_1, window_bounds = array<i64: 8, 128>}, {transform_indices = @transform_2, window_bounds = array<i64: 8, 1>}]} {
    %c0 = arith.constant 0 : index
    %c0_0 = arith.constant 0 : index
    %0 = vector.load %arg1[%c0, %c0_0] : memref<8x128xf32, #tpu.memory_space<vmem>>, vector<8x128xf32>
    %c0_1 = arith.constant 0 : index
    %c0_2 = arith.constant 0 : index
    %1 = vector.load %arg2[%c0_1, %c0_2] : memref<8x128xf32, #tpu.memory_space<vmem>>, vector<8x128xf32>
    %cst = arith.constant dense<0xFF800000> : vector<8xf32>
    %2 = vector.multi_reduction <maximumf>, %0, %cst [1] : vector<8x128xf32> to vector<8xf32>
    %3 = vector.shape_cast %2 : vector<8xf32> to vector<8x1xf32>
    %4 = vector.broadcast %3 : vector<8x1xf32> to vector<8x128xf32>
    %5 = arith.subf %0, %4 : vector<8x128xf32>
    %6 = math.exp %5 : vector<8x128xf32>
    %7 = arith.mulf %1, %0 : vector<8x128xf32>
    %cst_3 = arith.constant dense<0.000000e+00> : vector<8xf32>
    %8 = vector.multi_reduction <add>, %6, %cst_3 [1] : vector<8x128xf32> to vector<8xf32>
    %9 = vector.shape_cast %8 : vector<8xf32> to vector<8x1xf32>
    %cst_4 = arith.constant dense<0.000000e+00> : vector<8xf32>
    %10 = vector.multi_reduction <add>, %1, %cst_4 [1] : vector<8x128xf32> to vector<8xf32>
    %11 = vector.shape_cast %10 : vector<8xf32> to vector<8x1xf32>
    %cst_5 = arith.constant dense<0.000000e+00> : vector<8xf32>
    %12 = vector.multi_reduction <add>, %7, %cst_5 [1] : vector<8x128xf32> to vector<8xf32>
    %13 = vector.shape_cast %12 : vector<8xf32> to vector<8x1xf32>
    %14 = math.log %9 : vector<8x1xf32>
    %15 = arith.addf %3, %14 : vector<8x1xf32>
    %16 = arith.mulf %11, %15 : vector<8x1xf32>
    %17 = arith.subf %16, %13 : vector<8x1xf32>
    %c0_6 = arith.constant 0 : index
    %c0_7 = arith.constant 0 : index
    %18 = vector.load %arg3[%c0_6, %c0_7] : memref<8x1xf32, #tpu.memory_space<vmem>>, vector<8x1xf32>
    tpu.vector_store %arg3[%c0_6, %c0_7], %17 {strides = array<i32>} : memref<8x1xf32, #tpu.memory_space<vmem>>, vector<8x1xf32>,
    return
  }
  func.func @transform_0(%arg0: i32) -> (i32, i32) {
    %c0_i32 = arith.constant 0 : i32
    %c0_i32_0 = arith.constant 0 : i32
    return %arg0, %c0_i32 : i32, i32
  }
  func.func @transform_1(%arg0: i32) -> (i32, i32) {
    %c0_i32 = arith.constant 0 : i32
    %c0_i32_0 = arith.constant 0 : i32
    return %arg0, %c0_i32 : i32, i32
  }
  func.func @transform_2(%arg0: i32) -> (i32, i32) {
    %c0_i32 = arith.constant 0 : i32
    %c0_i32_0 = arith.constant 0 : i32
    return %arg0, %c0_i32 : i32, i32
  }
}

</mosaic_0001>

<bundles_post_ra>
// kernel: tpu_custom_call.1
= control target key start
LH: loop header
LB: loop body
LE: loop exit
PB: predicated region body
PF: predicated region fallthrough
CT: control target
= control target key end

     0   :  { %7 = vsyncpa [#allocation3], 0  ;;  %s160_s0 = inlined_call_operand.hbm [shape: f32[8,128], index: 0, kind: input, shape index: {}]   ;;  %s161_s1 = inlined_call_operand.hbm [shape: f32[8,128], index: 1, kind: input, shape index: {}]   ;;  %s162_s2 = inlined_call_operand.vmem [shape: f32[8,1], index: 2, kind: output, shape index: {}]  }
   0x1   :  { %8 = vsyncpa [#allocation5], 0  ;;  %s116_s9 = smov [#allocation2]   ;;  %s117_s11 = smov [#allocation4]  }
   0x2   :  { %s15_s10 = sshll.u32 %s116_s9, 4  ;;  %s25_s12 = sshll.u32 %s117_s11, 4  ;;  %s16_s10 = int_to_ptr.vmem [resolvable:$true] %s15_s10  ;;  %s26_s12 = int_to_ptr.vmem [resolvable:$true] %s25_s12 }
   0x3   :  { %s68_s15 = scalar_lea.hbm %s160_s0, 128 }
   0x4   :  { %p69_p0 = scmp.ne.s32.totalorder %s160_s0, %s68_s15  ;;  %p72_p1 = scmp.lt.u32.totalorder %s68_s15, %s160_s0 }
   0x6   :  { %p74_p2 = pnand %p72_p1, %p69_p0 }
   0x8   :  { %77 = shalt.err (!%p74_p2)
}
   0x9   :  { %s78_s20 = scalar_lea.vmem %s16_s10, 128  ;;  %p83_p4 = scmp.lt.s32.totalorder %s16_s10, %s16_s10 }
   0xa   :  { %p79_p3 = scmp.ne.s32.totalorder %s16_s10, %s78_s20  ;;  %p84_p5 = scmp.lt.s32.totalorder %s78_s20, %s78_s20 }
   0xc   :  { %p85_p6 = por %p84_p5, %p83_p4 }
   0xe   :  { %p86_p7 = pnand %p85_p6, %p79_p3 }
  0x10   :  { %89 = shalt.err (!%p86_p7)
}
  0x11   :  { %18 = dma.hbm_to_vmem [thread:$0]  %s160_s0, 128, %s16_s10, [#allocation3]  }
  0x12   :  { %s90_s25 = scalar_lea.hbm %s161_s1, 128 }
  0x13   :  { %p91_p8 = scmp.ne.s32.totalorder %s161_s1, %s90_s25  ;;  %p94_p9 = scmp.lt.u32.totalorder %s90_s25, %s161_s1 }
  0x15   :  { %p96_p10 = pnand %p94_p9, %p91_p8 }
  0x17   :  { %99 = shalt.err (!%p96_p10)
}
  0x18   :  { %s100_s30 = scalar_lea.vmem %s26_s12, 128  ;;  %p105_p12 = scmp.lt.s32.totalorder %s26_s12, %s26_s12 }
  0x19   :  { %p101_p11 = scmp.ne.s32.totalorder %s26_s12, %s100_s30  ;;  %p106_p13 = scmp.lt.s32.totalorder %s100_s30, %s100_s30 }
  0x1b   :  { %p107_p0 = por %p106_p13, %p105_p12 }
  0x1d   :  { %p108_p1 = pnand %p107_p0, %p101_p11 }
  0x1f   :  { %111 = shalt.err (!%p108_p1)
}
  0x20   :  { %28 = dma.hbm_to_vmem [thread:$0]  %s161_s1, 128, %s26_s12, [#allocation5]  }
  0x21   :  { %112 = dma.done.wait [#allocation3], 128  }
  0x22   :  { %113 = vsyncadd [#allocation3], 4294967168 }
  0x23   :  { %114 = dma.done.wait [#allocation5], 128  }
  0x24   :  { %115 = vsyncadd [#allocation5], 4294967168  ;;  %v35_v0 = vld [vmem:[#allocation2] sm:$0xff]  ;;  %v36_v1 = vld [vmem:[#allocation4] sm:$0xff]  ;;  %vm54_vm0 = vcmask 7168  }
  0x25   :  { %37 = vmax.xlane.f32.xlu0 %v35_v0  ;;  %45 = vadd.xlane.f32.xlu1 %v36_v1  ;;  %v42_v2 = vmul.f32 %v36_v1, %v35_v0 }
  0x29   :  { %47 = vadd.xlane.f32.xlu1 %v42_v2 }
  0xb2   :  { %v38_v3 = vpop.xlane.xlu0 %37  ;;  %v46_v8 = vpop.xlane.xlu1 %45 }
  0xb3   :  { %v39_v4 = vsub.f32 %v35_v0, %v38_v3 }
  0xb5   :  { %v40_v5 = vmul.f32 1.442695, %v39_v4 }
  0xb6   :  { %v48_v12 = vpop.xlane.xlu1 %47 }
  0xb7   :  { %64 = vpow2.f32 %v40_v5 }
  0xc1   :  { %v65_v6 = vpop.eup %64 }
  0xc2   :  { %43 = vadd.xlane.f32.xlu0 %v65_v6 }
 0x14f   :  { %v44_v7 = vpop.xlane.xlu0 %43 }
 0x150   :  { %66 = vlog2.f32 %v44_v7 }
 0x15a   :  { %v67_v9 = vpop.eup %66 }
 0x15b   :  { %v50_v10 = vmul.f32 0.6931472, %v67_v9 }
 0x15d   :  { %v51_v11 = vadd.f32 %v50_v10, %v38_v3 }
 0x15f   :  { %v52_v13 = vmul.f32 %v51_v11, %v46_v8 }
 0x161   :  { %v53_v14 = vsub.f32 %v52_v13, %v48_v12 }
 0x163   :  { %55 = vst.msk [vmem:[%s162_s2] sm:$0xff] %vm54_vm0, %v53_v14 }
 0x164   :  { %60 = vsyncpa [#allocation3], 1 }
 0x165   :  { %61 = vsyncpa [#allocation5], 1 }

</bundles_post_ra>
